<compile_context>
chip_gen: v7x
topology: tpu7x:2x2x1
jax: 0.10.0
libtpu: 0.0.40
codegen_flags: <defaults>
</compile_context>

<pallas_src>
import functools

import jax
import jax.numpy as jnp
from jax.experimental import pallas as pl
from jax.experimental.pallas import tpu as pltpu

NN_LAYER_1 = 400
NN_LAYER_2 = 300

H1_PAD = 512    # 400 -> 512 (lane multiple)
H2_PAD = 384    # 300 -> 384
OUT_PAD = 128   # act_dim -> 128


def _round_up(x, m):
    return (x + m - 1) // m * m


def _policy_kernel(x_ref, w_ref, b_ref, o_ref, *, s_pad, action_scale):
    # Activations go to the MXU in bf16; accumulation is f32 throughout.
    x = x_ref[...].astype(jnp.bfloat16)

    # Static, aligned slices of the packed parameter buffers (zero-cost views).
    w1 = w_ref[0:s_pad, :]                                          # [s_pad, 512]
    w2 = w_ref[s_pad:s_pad + H1_PAD, 0:H2_PAD]                      # [512, 384]
    w3 = w_ref[s_pad + H1_PAD:s_pad + H1_PAD + H2_PAD, 0:OUT_PAD]   # [384, 128]

    b1 = b_ref[0:1, :]                                              # [1, 512]
    b2 = b_ref[8:9, 0:H2_PAD]                                       # [1, 384]
    b3 = b_ref[16:17, 0:OUT_PAD]                                    # [1, 128]

    h1 = jnp.dot(x, w1, preferred_element_type=jnp.float32) + b1
    h1 = jnp.maximum(h1, 0.0).astype(jnp.bfloat16)

    h2 = jnp.dot(h1, w2, preferred_element_type=jnp.float32) + b2
    h2 = jnp.maximum(h2, 0.0).astype(jnp.bfloat16)

    mu = jnp.dot(h2, w3, preferred_element_type=jnp.float32) + b3
    # NOTE: action_scale is a scalar here (matches the PyTorch module). A
    # per-dimension scale would be passed as an extra [1, OUT_PAD] VMEM input.
    o_ref[...] = (jnp.tanh(mu) * action_scale).astype(o_ref.dtype)


def pack_params(params, state_dim, act_dim):
    """Pack weights into one pre-padded bf16 buffer, biases into one f32 buffer."""
    s_pad = _round_up(state_dim, 128)

    w_all = jnp.zeros((s_pad + H1_PAD + H2_PAD, H1_PAD), jnp.float32)
    w_all = w_all.at[:state_dim, :NN_LAYER_1].set(params["w1"])
    w_all = w_all.at[s_pad:s_pad + NN_LAYER_1, :NN_LAYER_2].set(params["w2"])
    w_all = w_all.at[s_pad + H1_PAD:s_pad + H1_PAD + NN_LAYER_2, :act_dim].set(
        params["w3"])
    w_all = w_all.astype(jnp.bfloat16)

    b_all = jnp.zeros((24, H1_PAD), jnp.float32)       # rows 0 / 8 / 16 used
    b_all = b_all.at[0, :NN_LAYER_1].set(params["b1"])
    b_all = b_all.at[8, :NN_LAYER_2].set(params["b2"])
    b_all = b_all.at[16, :act_dim].set(params["b3"])
    return w_all, b_all


def double_policy_net_forward(x, w_all, b_all, *, state_dim, act_dim, action_scale):
    """x: [B, state_dim] f32. w_all/b_all from pack_params. Returns [B, act_dim] f32."""
    B = x.shape[0]
    s_pad = w_all.shape[0] - H1_PAD - H2_PAD

    # Batch tile: multiples of 256 keep the v6e/v7x MXU full; small batches are
    # padded to the sublane multiple (8) and run as a single grid step.
    TB = 256 if B >= 256 else _round_up(B, 8)
    B_pad = _round_up(B, TB)

    x_pad = jnp.zeros((B_pad, s_pad), x.dtype).at[:B, :state_dim].set(x)

    kernel = functools.partial(_policy_kernel, s_pad=s_pad,
                               action_scale=float(action_scale))

    flops = 2 * B_pad * (s_pad * H1_PAD + H1_PAD * H2_PAD + H2_PAD * OUT_PAD)
    bytes_accessed = (x_pad.size * 4 + w_all.size * 2 + b_all.size * 4
                      + B_pad * OUT_PAD * 4)

    out = pl.pallas_call(
        kernel,
        out_shape=jax.ShapeDtypeStruct((B_pad, OUT_PAD), jnp.float32),
        grid_spec=pl.GridSpec(
            grid=(B_pad // TB,),
            in_specs=[
                pl.BlockSpec((TB, s_pad), lambda i: (i, 0)),    # batch-tiled x
                pl.BlockSpec(w_all.shape, lambda i: (0, 0)),    # resident weights
                pl.BlockSpec(b_all.shape, lambda i: (0, 0)),    # resident biases
            ],
            out_specs=pl.BlockSpec((TB, OUT_PAD), lambda i: (i, 0)),
        ),
        compiler_params=pltpu.CompilerParams(
            dimension_semantics=("parallel",)),
        cost_estimate=pl.CostEstimate(
            flops=flops,
            transcendentals=B_pad * OUT_PAD,
            bytes_accessed=bytes_accessed),
    )(x_pad, w_all, b_all)

    return out[:B, :act_dim]


def init_params(key, state_dim, act_dim):
    """Deterministic init mimicking PyTorch nn.Linear default (U[-1/sqrt(fan_in), +])."""
    ks = jax.random.split(key, 6)

    def linear(kw, kb, fan_in, fan_out):
        bound = 1.0 / float(fan_in) ** 0.5
        w = jax.random.uniform(kw, (fan_in, fan_out), jnp.float32, -bound, bound)
        b = jax.random.uniform(kb, (fan_out,), jnp.float32, -bound, bound)
        return w, b

    w1, b1 = linear(ks[0], ks[1], state_dim, NN_LAYER_1)
    w2, b2 = linear(ks[2], ks[3], NN_LAYER_1, NN_LAYER_2)
    w3, b3 = linear(ks[4], ks[5], NN_LAYER_2, act_dim)
    return {"w1": w1, "b1": b1, "w2": w2, "b2": b2, "w3": w3, "b3": b3}


def _reference(x, params, action_scale):
    """Plain-JAX reference with the same bf16-weight / f32-accumulate numerics."""
    w1 = params["w1"].astype(jnp.bfloat16)
    w2 = params["w2"].astype(jnp.bfloat16)
    w3 = params["w3"].astype(jnp.bfloat16)
    h1 = jnp.maximum(
        jnp.dot(x.astype(jnp.bfloat16), w1, preferred_element_type=jnp.float32)
        + params["b1"], 0.0)
    h2 = jnp.maximum(
        jnp.dot(h1.astype(jnp.bfloat16), w2, preferred_element_type=jnp.float32)
        + params["b2"], 0.0)
    mu = (jnp.dot(h2.astype(jnp.bfloat16), w3, preferred_element_type=jnp.float32)
          + params["b3"])
    return jnp.tanh(mu) * action_scale


if __name__ == "__main__":
    key = jax.random.PRNGKey(0)
    k_params, k_x, k_x2 = jax.random.split(key, 3)

    batch = 2
    state_dim = 8
    act_dim = 4
    action_scale = 2.0

    params = init_params(k_params, state_dim, act_dim)
    w_all, b_all = pack_params(params, state_dim, act_dim)

    # small batch (single grid step)
    x = jax.random.normal(k_x, (batch, state_dim), jnp.float32)
    mu = jax.block_until_ready(
        double_policy_net_forward(x, w_all, b_all, state_dim=state_dim,
                                  act_dim=act_dim, action_scale=action_scale))
    ref = _reference(x, params, action_scale)
    assert mu.shape == (batch, act_dim)
    assert jnp.allclose(mu, ref, atol=2e-3, rtol=2e-3), "mismatch (B=2)"

    # larger batch exercises the multi-tile pipelined path (padding + 3 grid steps)
    batch2 = 640
    x2 = jax.random.normal(k_x2, (batch2, state_dim), jnp.float32)
    mu2 = jax.block_until_ready(
        double_policy_net_forward(x2, w_all, b_all, state_dim=state_dim,
                                  act_dim=act_dim, action_scale=action_scale))
    ref2 = _reference(x2, params, action_scale)
    assert mu2.shape == (batch2, act_dim)
    assert jnp.allclose(mu2, ref2, atol=2e-3, rtol=2e-3), "mismatch (B=640)"

    print("KERNEL_OK")
</pallas_src>

<mosaic_0001>
module attributes {stable_mosaic.version = 11 : i64} {
  func.func @_policy_kernel(%arg0: i32, %arg1: memref<8x128xf32, #tpu.memory_space<vmem>>, %arg2: memref<1024x512xbf16, #tpu.memory_space<vmem>>, %arg3: memref<24x512xf32, #tpu.memory_space<vmem>>, %arg4: memref<8x128xf32, #tpu.memory_space<vmem>>) attributes {dimension_semantics = [#tpu.dimension_semantics<parallel>], iteration_bounds = array<i64: 1>, scalar_prefetch = 0 : i64, scratch_operands = 0 : i64, tpu.core_type = #tpu.core_type<tc>, window_params = [{transform_indices = @transform_0, window_bounds = array<i64: 8, 128>}, {pipeline_mode = #tpu.pipeline_mode<synchronous>, transform_indices = @transform_1, window_bounds = array<i64: 1024, 512>}, {pipeline_mode = #tpu.pipeline_mode<synchronous>, transform_indices = @transform_2, window_bounds = array<i64: 24, 512>}, {transform_indices = @transform_3, window_bounds = array<i64: 8, 128>}]} {
    %c0 = arith.constant 0 : index
    %c0_0 = arith.constant 0 : index
    %0 = vector.load %arg1[%c0, %c0_0] : memref<8x128xf32, #tpu.memory_space<vmem>>, vector<8x128xf32>
    %1 = arith.truncf %0 : vector<8x128xf32> to vector<8x128xbf16>
    %c0_1 = arith.constant 0 : index
    %c0_2 = arith.constant 0 : index
    %2 = vector.load %arg2[%c0_1, %c0_2] : memref<1024x512xbf16, #tpu.memory_space<vmem>>, vector<128x512xbf16>
    %c128 = arith.constant 128 : index
    %c0_3 = arith.constant 0 : index
    %3 = vector.load %arg2[%c128, %c0_3] : memref<1024x512xbf16, #tpu.memory_space<vmem>>, vector<512x384xbf16>
    %c640 = arith.constant 640 : index
    %c0_4 = arith.constant 0 : index
    %4 = vector.load %arg2[%c640, %c0_4] : memref<1024x512xbf16, #tpu.memory_space<vmem>>, vector<384x128xbf16>
    %c0_5 = arith.constant 0 : index
    %c0_6 = arith.constant 0 : index
    %5 = vector.load %arg3[%c0_5, %c0_6] : memref<24x512xf32, #tpu.memory_space<vmem>>, vector<1x512xf32>
    %c8 = arith.constant 8 : index
    %c0_7 = arith.constant 0 : index
    %6 = vector.load %arg3[%c8, %c0_7] : memref<24x512xf32, #tpu.memory_space<vmem>>, vector<1x384xf32>
    %c16 = arith.constant 16 : index
    %c0_8 = arith.constant 0 : index
    %7 = vector.load %arg3[%c16, %c0_8] : memref<24x512xf32, #tpu.memory_space<vmem>>, vector<1x128xf32>
    %cst = arith.constant dense<0.000000e+00> : vector<8x512xf32>
    %8 = tpu.matmul %1, %2, %cst {dimension_numbers = #tpu.dot_dimension_numbers<[1], [0], [0], [1], [0, 0, 1, 1], [], []>} : vector<8x128xbf16>, vector<128x512xbf16>, vector<8x512xf32> -> vector<8x512xf32>
    %9 = vector.broadcast %5 : vector<1x512xf32> to vector<8x512xf32>
    %10 = arith.addf %8, %9 : vector<8x512xf32>
    %cst_9 = arith.constant 0.000000e+00 : f32
    %11 = vector.broadcast %cst_9 : f32 to vector<8x512xf32>
    %12 = arith.maximumf %10, %11 : vector<8x512xf32>
    %13 = arith.truncf %12 : vector<8x512xf32> to vector<8x512xbf16>
    %cst_10 = arith.constant dense<0.000000e+00> : vector<8x384xf32>
    %14 = tpu.matmul %13, %3, %cst_10 {dimension_numbers = #tpu.dot_dimension_numbers<[1], [0], [0], [1], [0, 0, 1, 1], [], []>} : vector<8x512xbf16>, vector<512x384xbf16>, vector<8x384xf32> -> vector<8x384xf32>
    %15 = vector.broadcast %6 : vector<1x384xf32> to vector<8x384xf32>
    %16 = arith.addf %14, %15 : vector<8x384xf32>
    %cst_11 = arith.constant 0.000000e+00 : f32
    %17 = vector.broadcast %cst_11 : f32 to vector<8x384xf32>
    %18 = arith.maximumf %16, %17 : vector<8x384xf32>
    %19 = arith.truncf %18 : vector<8x384xf32> to vector<8x384xbf16>
    %cst_12 = arith.constant dense<0.000000e+00> : vector<8x128xf32>
    %20 = tpu.matmul %19, %4, %cst_12 {dimension_numbers = #tpu.dot_dimension_numbers<[1], [0], [0], [1], [0, 0, 1, 1], [], []>} : vector<8x384xbf16>, vector<384x128xbf16>, vector<8x128xf32> -> vector<8x128xf32>
    %21 = vector.broadcast %7 : vector<1x128xf32> to vector<8x128xf32>
    %22 = arith.addf %20, %21 : vector<8x128xf32>
    %23 = math.tanh %22 : vector<8x128xf32>
    %cst_13 = arith.constant 2.000000e+00 : f32
    %24 = vector.broadcast %cst_13 : f32 to vector<8x128xf32>
    %25 = arith.mulf %23, %24 : vector<8x128xf32>
    %c0_14 = arith.constant 0 : index
    %c0_15 = arith.constant 0 : index
    %26 = vector.load %arg4[%c0_14, %c0_15] : memref<8x128xf32, #tpu.memory_space<vmem>>, vector<8x128xf32>
    tpu.vector_store %arg4[%c0_14, %c0_15], %25 {strides = array<i32>} : memref<8x128xf32, #tpu.memory_space<vmem>>, vector<8x128xf32>,
    return
  }
  func.func @transform_0(%arg0: i32) -> (i32, i32) {
    %c0_i32 = arith.constant 0 : i32
    %c0_i32_0 = arith.constant 0 : i32
    return %arg0, %c0_i32 : i32, i32
  }
  func.func @transform_1(%arg0: i32) -> (i32, i32) {
    %c0_i32 = arith.constant 0 : i32
    %c0_i32_0 = arith.constant 0 : i32
    %c0_i32_1 = arith.constant 0 : i32
    return %c0_i32, %c0_i32_0 : i32, i32
  }
  func.func @transform_2(%arg0: i32) -> (i32, i32) {
    %c0_i32 = arith.constant 0 : i32
    %c0_i32_0 = arith.constant 0 : i32
    %c0_i32_1 = arith.constant 0 : i32
    return %c0_i32, %c0_i32_0 : i32, i32
  }
  func.func @transform_3(%arg0: i32) -> (i32, i32) {
    %c0_i32 = arith.constant 0 : i32
    %c0_i32_0 = arith.constant 0 : i32
    return %arg0, %c0_i32 : i32, i32
  }
}

</mosaic_0001>

<bundles_post_ra>
// kernel: tpu_custom_call.1
= control target key start
LH: loop header
LB: loop body
LE: loop exit
PB: predicated region body
PF: predicated region fallthrough
CT: control target
= control target key end

     0   :  { %8 = vsyncpa [#allocation3], 0  ;;  %s2142_s0 = inlined_call_operand.hbm [shape: f32[8,128], index: 0, kind: input, shape index: {}]   ;;  %s2143_s1 = inlined_call_operand.hbm [shape: bf16[1024,512], index: 1, kind: input, shape index: {}]   ;;  %s2144_s2 = inlined_call_operand.hbm [shape: f32[24,512], index: 2, kind: input, shape index: {}]   ;;  %s2145_s3 = inlined_call_operand.hbm [shape: f32[8,128], index: 3, kind: output, shape index: {}]  }
   0x1   :  { %9 = vsyncpa [#allocation6], 0 }
   0x2   :  { %10 = vsyncpa [#allocation4], 0  ;;  %s2039_s12 = smov [#allocation5]   ;;  %s1945_s16 = scalar_lea.hbm %s2143_s1, 32768 }
   0x3   :  { %s26_s13 = sshll.u32 %s2039_s12, 4  ;;  %p1946_p0 = scmp.ne.s32.totalorder %s2143_s1, %s1945_s16  ;;  %s27_s13 = int_to_ptr.vmem [resolvable:$true] %s26_s13 }
   0x4   :  { %p1949_p1 = scmp.lt.u32.totalorder %s1945_s16, %s2143_s1 }
   0x6   :  { %p1951_p2 = pnand %p1949_p1, %p1946_p0 }
   0x8   :  { %1954 = shalt.err (!%p1951_p2)
}
   0x9   :  { %s1955_s21 = scalar_lea.vmem %s27_s13, 32768  ;;  %p1960_p4 = scmp.lt.s32.totalorder %s27_s13, %s27_s13 }
   0xa   :  { %p1956_p3 = scmp.ne.s32.totalorder %s27_s13, %s1955_s21  ;;  %p1961_p5 = scmp.lt.s32.totalorder %s1955_s21, %s1955_s21 }
   0xc   :  { %p1962_p6 = por %p1961_p5, %p1960_p4 }
   0xe   :  { %p1963_p7 = pnand %p1962_p6, %p1956_p3 }
  0x10   :  { %1966 = shalt.err (!%p1963_p7)
}
  0x11   :  { %s2040_s22 = smov 256   ;;  %s2041_s23 = smov 16  }
  0x12   :  { %32 = dma.hbm_to_vmem [thread:$0]  %s2143_s1, 32768, %s27_s13, [#allocation6], %s2040_s22, %s2040_s22, %s2041_s23  }
  0x13   :  { %s2042_s26 = smov [#allocation2]   ;;  %s2043_s28 = smov [#allocation7]  }
  0x14   :  { %s17_s27 = sshll.u32 %s2042_s26, 4  ;;  %s38_s29 = sshll.u32 %s2043_s28, 4  ;;  %s18_s27 = int_to_ptr.vmem [resolvable:$true] %s17_s27  ;;  %s39_s29 = int_to_ptr.vmem [resolvable:$true] %s38_s29 }
  0x15   :  { %s1967_s5 = scalar_lea.hbm %s2142_s0, 128 }
  0x16   :  { %p1968_p8 = scmp.ne.s32.totalorder %s2142_s0, %s1967_s5  ;;  %p1971_p9 = scmp.lt.u32.totalorder %s1967_s5, %s2142_s0 }
  0x18   :  { %p1973_p10 = pnand %p1971_p9, %p1968_p8 }
  0x1a   :  { %1976 = shalt.err (!%p1973_p10)
}
  0x1b   :  { %s1977_s1 = scalar_lea.vmem %s18_s27, 128  ;;  %p1982_p12 = scmp.lt.s32.totalorder %s18_s27, %s18_s27 }
  0x1c   :  { %p1978_p11 = scmp.ne.s32.totalorder %s18_s27, %s1977_s1  ;;  %p1983_p13 = scmp.lt.s32.totalorder %s1977_s1, %s1977_s1 }
  0x1e   :  { %p1984_p0 = por %p1983_p13, %p1982_p12 }
  0x20   :  { %p1985_p1 = pnand %p1984_p0, %p1978_p11 }
  0x22   :  { %1988 = shalt.err (!%p1985_p1)
}
  0x23   :  { %20 = dma.hbm_to_vmem [thread:$0]  %s2142_s0, 128, %s18_s27, [#allocation3]  }
  0x24   :  { %s1989_s14 = scalar_lea.hbm %s2144_s2, 1536 }
  0x25   :  { %p1990_p2 = scmp.ne.s32.totalorder %s2144_s2, %s1989_s14  ;;  %p1993_p3 = scmp.lt.u32.totalorder %s1989_s14, %s2144_s2 }
  0x27   :  { %p1995_p4 = pnand %p1993_p3, %p1990_p2 }
  0x29   :  { %1998 = shalt.err (!%p1995_p4)
}
  0x2a   :  { %s1999_s19 = scalar_lea.vmem %s39_s29, 1536  ;;  %p2004_p6 = scmp.lt.s32.totalorder %s39_s29, %s39_s29 }
  0x2b   :  { %p2000_p5 = scmp.ne.s32.totalorder %s39_s29, %s1999_s19  ;;  %p2005_p7 = scmp.lt.s32.totalorder %s1999_s19, %s1999_s19 }
  0x2d   :  { %p2006_p8 = por %p2005_p7, %p2004_p6 }
  0x2f   :  { %p2007_p9 = pnand %p2006_p8, %p2000_p5 }
  0x31   :  { %2010 = shalt.err (!%p2007_p9)
}
  0x32   :  { %s2044_s0 = smov 512   ;;  %s2045_s20 = smov 32  }
  0x33   :  { %44 = dma.hbm_to_vmem [thread:$0]  %s2144_s2, 1536, %s39_s29, [#allocation6], %s2044_s0, %s2044_s0, %s2045_s20  }
  0x34   :  { %2033 = dma.done.wait [#allocation3], 128  }
  0x35   :  { %2034 = vsyncadd [#allocation3], 4294967168 }
  0x36   :  { %2035 = dma.done.wait [#allocation6], 34304  }
  0x37   :  { %2036 = vsyncadd [#allocation6], 4294932992  ;;  %v2046_v0 = vmov 0   ;;  %v1743_v1 = vld [vmem:[#allocation5 + $0x4] ss:$16 sps:$4 sm:$0xff]   ;;  %v55_v26 = vld [vmem:[#allocation2] sm:$0xff] }
  0x38   :  { %482 = vmatprep.mubr.bf16.mxu0 %v2046_v0  ;;  %523 = vmatprep.mubr.bf16.mxu1 %v2046_v0  ;;  %v1745_v2 = vld [vmem:[#allocation5] ss:$16 sps:$4 sm:$0xff]   ;;  %v1746_v3 = vld [vmem:[#allocation5 + $0x24] ss:$16 sps:$4 sm:$0xff]   ;;  %v1767_v10 = vld [vmem:[#allocation5 + $0xc] ss:$16 sps:$4 sm:$0xff]   ;;  %v56_v30 = vpack.c.bf16 %v55_v26, %v55_v26 }
  0x39   :  { %450 = vmatprep.subr.bf16.mxu0 %v1743_v1  ;;  %v1748_v4 = vld [vmem:[#allocation5 + $0x20] ss:$16 sps:$4 sm:$0xff]   ;;  %v1749_v5 = vld [vmem:[#allocation5 + $0x44] ss:$16 sps:$4 sm:$0xff]   ;;  %v1769_v11 = vld [vmem:[#allocation5 + $0x8] ss:$16 sps:$4 sm:$0xff]   ;;  %491 = vmatprep.subr.bf16.mxu1 %v1767_v10 }
  0x3a   :  { %451 = vmatpush1.bf16.msra.mxu0 %v1745_v2  ;;  %v1751_v6 = vld [vmem:[#allocation5 + $0x40] ss:$16 sps:$4 sm:$0xff]   ;;  %v1752_v7 = vld [vmem:[#allocation5 + $0x64] ss:$16 sps:$4 sm:$0xff]   ;;  %v1770_v12 = vld [vmem:[#allocation5 + $0x2c] ss:$16 sps:$4 sm:$0xff]   ;;  %492 = vmatpush1.bf16.msra.mxu1 %v1769_v11 }
  0x3b   :  { %452 = vmatprep.subr.bf16.mxu0 %v1746_v3  ;;  %v1754_v8 = vld [vmem:[#allocation5 + $0x60] ss:$16 sps:$4 sm:$0xff]   ;;  %v1755_v9 = vld [vmem:[#allocation5 + $0x84] ss:$16 sps:$4 sm:$0xff]   ;;  %v1772_v14 = vld [vmem:[#allocation5 + $0x28] ss:$16 sps:$4 sm:$0xff]   ;;  %493 = vmatprep.subr.bf16.mxu1 %v1770_v12 }
  0x3c   :  { %v1757_v13 = vld [vmem:[#allocation5 + $0x80] ss:$16 sps:$4 sm:$0xff]   ;;  %v1773_v15 = vld [vmem:[#allocation5 + $0x4c] ss:$16 sps:$4 sm:$0xff]   ;;  %v1758_v16 = vld [vmem:[#allocation5 + $0xa4] ss:$16 sps:$4 sm:$0xff]  }
  0x3d   :  { %v1760_v17 = vld [vmem:[#allocation5 + $0xa0] ss:$16 sps:$4 sm:$0xff]   ;;  %v1775_v18 = vld [vmem:[#allocation5 + $0x48] ss:$16 sps:$4 sm:$0xff]   ;;  %v1776_v19 = vld [vmem:[#allocation5 + $0x6c] ss:$16 sps:$4 sm:$0xff]  }
  0x3e   :  { %453 = vmatpush1.bf16.msra.mxu0 %v1748_v4  ;;  %494 = vmatpush1.bf16.msra.mxu1 %v1772_v14  ;;  %v1761_v20 = vld [vmem:[#allocation5 + $0xc4] ss:$16 sps:$4 sm:$0xff]   ;;  %v1763_v21 = vld [vmem:[#allocation5 + $0xc0] ss:$16 sps:$4 sm:$0xff]   ;;  %v1778_v22 = vld [vmem:[#allocation5 + $0x68] ss:$16 sps:$4 sm:$0xff]  }
  0x3f   :  { %454 = vmatprep.subr.bf16.mxu0 %v1749_v5  ;;  %495 = vmatprep.subr.bf16.mxu1 %v1773_v15  ;;  %v1779_v23 = vld [vmem:[#allocation5 + $0x8c] ss:$16 sps:$4 sm:$0xff]   ;;  %v1764_v24 = vld [vmem:[#allocation5 + $0xe4] ss:$16 sps:$4 sm:$0xff]   ;;  %v1766_v25 = vld [vmem:[#allocation5 + $0xe0] ss:$16 sps:$4 sm:$0xff]  }
  0x40   :  { %v1781_v27 = vld [vmem:[#allocation5 + $0x88] ss:$16 sps:$4 sm:$0xff]   ;;  %v1782_v28 = vld [vmem:[#allocation5 + $0xac] ss:$16 sps:$4 sm:$0xff]   ;;  %v1793_v29 = vld [vmem:[#allocation5 + $0x104] ss:$16 sps:$4 sm:$0xff]  }
  0x41   :  { %v1784_v31 = vld [vmem:[#allocation5 + $0xa8] ss:$16 sps:$4 sm:$0xff]   ;;  %v1785_v32 = vld [vmem:[#allocation5 + $0xcc] ss:$16 sps:$4 sm:$0xff]   ;;  %v1791_v33 = vld [vmem:[#allocation5 + $0x100] ss:$16 sps:$4 sm:$0xff]  }
  0x42   :  { %455 = vmatpush1.bf16.msra.mxu0 %v1751_v6  ;;  %496 = vmatpush1.bf16.msra.mxu1 %v1775_v18  ;;  %v1796_v34 = vld [vmem:[#allocation5 + $0x124] ss:$16 sps:$4 sm:$0xff]   ;;  %v1787_v35 = vld [vmem:[#allocation5 + $0xc8] ss:$16 sps:$4 sm:$0xff]   ;;  %v1788_v36 = vld [vmem:[#allocation5 + $0xec] ss:$16 sps:$4 sm:$0xff]  }
  0x43   :  { %456 = vmatprep.subr.bf16.mxu0 %v1752_v7  ;;  %497 = vmatprep.subr.bf16.mxu1 %v1776_v19  ;;  %v1794_v37 = vld [vmem:[#allocation5 + $0x120] ss:$16 sps:$4 sm:$0xff]   ;;  %v1799_v38 = vld [vmem:[#allocation5 + $0x144] ss:$16 sps:$4 sm:$0xff]   ;;  %v1790_v39 = vld [vmem:[#allocation5 + $0xe8] ss:$16 sps:$4 sm:$0xff]  }
  0x44   :  { %v1797_v40 = vld [vmem:[#allocation5 + $0x140] ss:$16 sps:$4 sm:$0xff]   ;;  %v1818_v41 = vld [vmem:[#allocation5 + $0x208] ss:$16 sps:$4 sm:$0xff]   ;;  %v1802_v42 = vld [vmem:[#allocation5 + $0x164] ss:$16 sps:$4 sm:$0xff]  }
  0x45   :  { %v1819_v43 = vld [vmem:[#allocation5 + $0x108] ss:$16 sps:$4 sm:$0xff]   ;;  %v1800_v44 = vld [vmem:[#allocation5 + $0x160] ss:$16 sps:$4 sm:$0xff]   ;;  %v1805_v46 = vld [vmem:[#allocation5 + $0x184] ss:$16 sps:$4 sm:$0xff]  }
  0x46   :  { %457 = vmatpush1.bf16.msra.mxu0 %v1754_v8  ;;  %498 = vmatpush1.bf16.msra.mxu1 %v1778_v22  ;;  %v1823_v45 = vld [vmem:[#allocation5 + $0x228] ss:$16 sps:$4 sm:$0xff]   ;;  %v1803_v47 = vld [vmem:[#allocation5 + $0x180] ss:$16 sps:$4 sm:$0xff]   ;;  %v1808_v50 = vld [vmem:[#allocation5 + $0x1a4] ss:$16 sps:$4 sm:$0xff]  }
  0x47   :  { %458 = vmatprep.subr.bf16.mxu0 %v1755_v9  ;;  %499 = vmatprep.subr.bf16.mxu1 %v1779_v23  ;;  %v1824_v48 = vld [vmem:[#allocation5 + $0x128] ss:$16 sps:$4 sm:$0xff]   ;;  %v1806_v51 = vld [vmem:[#allocation5 + $0x1a0] ss:$16 sps:$4 sm:$0xff]   ;;  %v1811_v54 = vld [vmem:[#allocation5 + $0x1c4] ss:$16 sps:$4 sm:$0xff]  }
  0x48   :  { %v1828_v49 = vld [vmem:[#allocation5 + $0x248] ss:$16 sps:$4 sm:$0xff]   ;;  %v1809_v56 = vld [vmem:[#allocation5 + $0x1c0] ss:$16 sps:$4 sm:$0xff]   ;;  %v1814_v58 = vld [vmem:[#allocation5 + $0x1e4] ss:$16 sps:$4 sm:$0xff]  }
  0x49   :  { %v1829_v52 = vld [vmem:[#allocation5 + $0x148] ss:$16 sps:$4 sm:$0xff]   ;;  %v1812_v60 = vld [vmem:[#allocation5 + $0x1e0] ss:$16 sps:$4 sm:$0xff]   ;;  %v1817_v62 = vld [vmem:[#allocation5 + $0x204] ss:$16 sps:$4 sm:$0xff]  }
  0x4a   :  { %459 = vmatpush1.bf16.msra.mxu0 %v1757_v13  ;;  %500 = vmatpush1.bf16.msra.mxu1 %v1781_v27  ;;  %v1833_v53 = vld [vmem:[#allocation5 + $0x268] ss:$16 sps:$4 sm:$0xff]   ;;  %v1815_v0 = vld [vmem:[#allocation5 + $0x200] ss:$16 sps:$4 sm:$0xff]   ;;  %v1822_v1 = vld [vmem:[#allocation5 + $0x224] ss:$16 sps:$4 sm:$0xff]  }
  0x4b   :  { %460 = vmatprep.subr.bf16.mxu0 %v1758_v16  ;;  %501 = vmatprep.subr.bf16.mxu1 %v1782_v28  ;;  %v1834_v55 = vld [vmem:[#allocation5 + $0x168] ss:$16 sps:$4 sm:$0xff]   ;;  %v1820_v2 = vld [vmem:[#allocation5 + $0x220] ss:$16 sps:$4 sm:$0xff]   ;;  %v1827_v3 = vld [vmem:[#allocation5 + $0x244] ss:$16 sps:$4 sm:$0xff]  }
  0x4c   :  { %v1838_v57 = vld [vmem:[#allocation5 + $0x288] ss:$16 sps:$4 sm:$0xff]   ;;  %v1825_v4 = vld [vmem:[#allocation5 + $0x240] ss:$16 sps:$4 sm:$0xff]   ;;  %v1832_v5 = vld [vmem:[#allocation5 + $0x264] ss:$16 sps:$4 sm:$0xff]  }
  0x4d   :  { %v1839_v59 = vld [vmem:[#allocation5 + $0x188] ss:$16 sps:$4 sm:$0xff]   ;;  %v1830_v6 = vld [vmem:[#allocation5 + $0x260] ss:$16 sps:$4 sm:$0xff]   ;;  %v1837_v7 = vld [vmem:[#allocation5 + $0x284] ss:$16 sps:$4 sm:$0xff]  }
  0x4e   :  { %461 = vmatpush1.bf16.msra.mxu0 %v1760_v17  ;;  %502 = vmatpush1.bf16.msra.mxu1 %v1784_v31  ;;  %v1843_v61 = vld [vmem:[#allocation5 + $0x2a8] ss:$16 sps:$4 sm:$0xff]   ;;  %v1835_v8 = vld [vmem:[#allocation5 + $0x280] ss:$16 sps:$4 sm:$0xff]   ;;  %v1842_v9 = vld [vmem:[#allocation5 + $0x2a4] ss:$16 sps:$4 sm:$0xff]  }
  0x4f   :  { %462 = vmatprep.subr.bf16.mxu0 %v1761_v20  ;;  %503 = vmatprep.subr.bf16.mxu1 %v1785_v32  ;;  %v1844_v63 = vld [vmem:[#allocation5 + $0x1a8] ss:$16 sps:$4 sm:$0xff]   ;;  %v1840_v10 = vld [vmem:[#allocation5 + $0x2a0] ss:$16 sps:$4 sm:$0xff]   ;;  %v1847_v11 = vld [vmem:[#allocation5 + $0x2c4] ss:$16 sps:$4 sm:$0xff]  }
  0x50   :  { %v1848_v12 = vld [vmem:[#allocation5 + $0x2c8] ss:$16 sps:$4 sm:$0xff]   ;;  %v1845_v13 = vld [vmem:[#allocation5 + $0x2c0] ss:$16 sps:$4 sm:$0xff]   ;;  %v1852_v15 = vld [vmem:[#allocation5 + $0x2e4] ss:$16 sps:$4 sm:$0xff]  }
  0x51   :  { %v1849_v14 = vld [vmem:[#allocation5 + $0x1c8] ss:$16 sps:$4 sm:$0xff]   ;;  %v1850_v17 = vld [vmem:[#allocation5 + $0x2e0] ss:$16 sps:$4 sm:$0xff]   ;;  %v1857_v19 = vld [vmem:[#allocation5 + $0x304] ss:$16 sps:$4 sm:$0xff]  }
  0x52   :  { %463 = vmatpush1.bf16.msra.mxu0 %v1763_v21  ;;  %504 = vmatpush1.bf16.msra.mxu1 %v1787_v35  ;;  %v1853_v16 = vld [vmem:[#allocation5 + $0x2e8] ss:$16 sps:$4 sm:$0xff]   ;;  %v270_v21 = vlaneseq  ;;  %vm2048_vm0 = vmmov 0   ;;  %s2049_s2 = smov [#allocation8]  }
  0x53   :  { %464 = vmatprep.subr.bf16.mxu0 %v1764_v24  ;;  %505 = vmatprep.subr.bf16.mxu1 %v1788_v36  ;;  %v1854_v18 = vld [vmem:[#allocation5 + $0x1e8] ss:$16 sps:$4 sm:$0xff]   ;;  %s1469_s23 = sshll.u32 %s2049_s2, 4  ;;  %s1470_s23 = int_to_ptr.vmem [resolvable:$true] %s1469_s23 }
  0x54   :  { %v1858_v20 = vld [vmem:[#allocation5 + $0x408] ss:$16 sps:$4 sm:$0xff]   ;;  %v2106_v22 = vshrl.u32 %v270_v21, 7  ;;  %v1898_v21 = vld [vmem:[#allocation5 + $0x420] ss:$16 sps:$4 sm:$0xff]   ;;  %s2011_s24 = scalar_lea.vmem %s1470_s23, 128  ;;  %p2016_p11 = scmp.lt.s32.totalorder %s1470_s23, %s1470_s23 }
  0x55   :  { %v2109_v24 = vld [vmem:[#allocation7] ss:$8 sm:$0xf]  ;;  %p2012_p10 = scmp.ne.s32.totalorder %s1470_s23, %s2011_s24  ;;  %p2017_p12 = scmp.lt.s32.totalorder %s2011_s24, %s2011_s24 }
  0x56   :  { %465 = vmatpush1.bf16.msra.mxu0 %v1766_v25  ;;  %506 = vmatpush1.bf16.msra.mxu1 %v1790_v39  ;;  %v272_v23 = vsub.s32 0, %v2106_v22  ;;  %v276_v25 = vsub.s32 1, %v2106_v22  ;;  %v284_v36 = vsub.s32 3, %v2106_v22  ;;  %v1859_v39 = vld [vmem:[#allocation5 + $0x308] ss:$16 sps:$4 sm:$0xff]  }
  0x57   :  { %1068 = vmatprep.subr.bf16.mxu0 %v1793_v29  ;;  %1631 = vmatprep.subr.bf16.mxu1 %v1818_v41  ;;  %v1862_v41 = vld [vmem:[#allocation5 + $0x324] ss:$16 sps:$4 sm:$0xff]   ;;  %p2018_p13 = por %p2017_p12, %p2016_p11 }
  0x58   :  { %v273_v26 = vrot.slane %v2109_v24, %v272_v23  ;;  %v277_v27 = vrot.slane %v2109_v24, %v276_v25 }
  0x59   :  { %483 = vmatmul.mubr.bf16.vlgmr.msra.gmra.mrb[0].mxu0 %v56_v30  ;;  %524 = vmatmul.mubr.bf16.vlgmr.msra.gmra.mrb[0].mxu1 %v56_v30  ;;  %p2019_p0 = pnand %p2018_p13, %p2012_p10 }
  0x5a   :  { %1069 = vmatpush1.bf16.msra.mxu0 %v1791_v33  ;;  %1632 = vmatpush3.bf16.msra.mxu1 %v1819_v43  ;;  %v285_v43 = vrot.slane %v2109_v24, %v284_v36  ;;  %v1916_v36 = vld [vmem:[#allocation5 + $0x4e0] ss:$16 sps:$4 sm:$0xff]  }
  0x5b   :  { %1070 = vmatprep.subr.bf16.mxu0 %v1796_v34  ;;  %1633 = vmatprep.subr.bf16.mxu1 %v1823_v45  ;;  %v1864_v45 = vld [vmem:[#allocation5 + $0x328] ss:$16 sps:$4 sm:$0xff]  }
  0x5e   :  { %1071 = vmatpush1.bf16.msra.mxu0 %v1794_v37  ;;  %1634 = vmatpush3.bf16.msra.mxu1 %v1824_v48 }
  0x5f   :  { %1072 = vmatprep.subr.bf16.mxu0 %v1799_v38  ;;  %1635 = vmatprep.subr.bf16.mxu1 %v1828_v49  ;;  %v1855_v38 = vld [vmem:[#allocation5 + $0x300] ss:$16 sps:$4 sm:$0xff]  }
  0x62   :  { %1073 = vmatpush1.bf16.msra.mxu0 %v1797_v40  ;;  %1636 = vmatpush3.bf16.msra.mxu1 %v1829_v52  ;;  %v1865_v52 = vld [vmem:[#allocation5 + $0x340] ss:$16 sps:$4 sm:$0xff]  }
  0x63   :  { %1074 = vmatprep.subr.bf16.mxu0 %v1802_v42  ;;  %1637 = vmatprep.subr.bf16.mxu1 %v1833_v53  ;;  %v1863_v42 = vld [vmem:[#allocation5 + $0x428] ss:$16 sps:$4 sm:$0xff]  }
  0x64   :  { %v1869_v53 = vld [vmem:[#allocation5 + $0x348] ss:$16 sps:$4 sm:$0xff]  }
  0x66   :  { %1075 = vmatpush1.bf16.msra.mxu0 %v1800_v44  ;;  %1638 = vmatpush3.bf16.msra.mxu1 %v1834_v55  ;;  %v1860_v44 = vld [vmem:[#allocation5 + $0x320] ss:$16 sps:$4 sm:$0xff]   ;;  %v1872_v55 = vld [vmem:[#allocation5 + $0x364] ss:$16 sps:$4 sm:$0xff]  }
  0x67   :  { %1076 = vmatprep.subr.bf16.mxu0 %v1805_v46  ;;  %1639 = vmatprep.subr.bf16.mxu1 %v1838_v57  ;;  %v1867_v46 = vld [vmem:[#allocation5 + $0x344] ss:$16 sps:$4 sm:$0xff]  }
  0x6a   :  { %1077 = vmatpush1.bf16.msra.mxu0 %v1803_v47  ;;  %1640 = vmatpush3.bf16.msra.mxu1 %v1839_v59  ;;  %v1868_v47 = vld [vmem:[#allocation5 + $0x448] ss:$16 sps:$4 sm:$0xff]   ;;  %v1870_v59 = vld [vmem:[#allocation5 + $0x360] ss:$16 sps:$4 sm:$0xff]  }
  0x6b   :  { %1078 = vmatprep.subr.bf16.mxu0 %v1808_v50  ;;  %1641 = vmatprep.subr.bf16.mxu1 %v1843_v61  ;;  %v1877_v61 = vld [vmem:[#allocation5 + $0x384] ss:$16 sps:$4 sm:$0xff]  }
  0x6e   :  { %1079 = vmatpush1.bf16.msra.mxu0 %v1806_v51  ;;  %1642 = vmatpush3.bf16.msra.mxu1 %v1844_v63  ;;  %v280_v63 = vsub.s32 2, %v2106_v22  ;;  %v1937_v22 = vld [vmem:[#allocation5 + $0x740] ss:$16 sps:$4 sm:$0xff]  }
  0x6f   :  { %1080 = vmatprep.subr.bf16.mxu0 %v1811_v54  ;;  %1643 = vmatprep.subr.bf16.mxu1 %v1848_v12  ;;  %v1892_v12 = vld [vmem:[#allocation5 + $0x3e4] ss:$16 sps:$4 sm:$0xff]  }
  0x72   :  { %1081 = vmatpush1.bf16.msra.mxu0 %v1809_v56  ;;  %1644 = vmatpush3.bf16.msra.mxu1 %v1849_v14  ;;  %v1873_v56 = vld [vmem:[#allocation5 + $0x468] ss:$16 sps:$4 sm:$0xff]  }
  0x73   :  { %1082 = vmatprep.subr.bf16.mxu0 %v1814_v58  ;;  %1645 = vmatprep.subr.bf16.mxu1 %v1853_v16  ;;  %v1894_v16 = vld [vmem:[#allocation5 + $0x3e8] ss:$16 sps:$4 sm:$0xff]  }
  0x76   :  { %1083 = vmatpush1.bf16.msra.mxu0 %v1812_v60  ;;  %1646 = vmatpush3.bf16.msra.mxu1 %v1854_v18  ;;  %v1874_v60 = vld [vmem:[#allocation5 + $0x368] ss:$16 sps:$4 sm:$0xff]  }
  0x77   :  { %1084 = vmatprep.subr.bf16.mxu0 %v1817_v62  ;;  %1653 = vmatprep.subr.bf16.mxu1 %v1858_v20  ;;  %v1878_v62 = vld [vmem:[#allocation5 + $0x488] ss:$16 sps:$4 sm:$0xff]   ;;  %v1900_v20 = vld [vmem:[#allocation5 + $0x424] ss:$16 sps:$4 sm:$0xff]  }
  0x7a   :  { %1085 = vmatpush1.bf16.msra.mxu0 %v1815_v0  ;;  %v1875_v0 = vld [vmem:[#allocation5 + $0x380] ss:$16 sps:$4 sm:$0xff]  }
  0x7b   :  { %1086 = vmatprep.subr.bf16.mxu0 %v1822_v1  ;;  %v1879_v1 = vld [vmem:[#allocation5 + $0x388] ss:$16 sps:$4 sm:$0xff]  }
  0x7e   :  { %1087 = vmatpush1.bf16.msra.mxu0 %v1820_v2  ;;  %v1882_v2 = vld [vmem:[#allocation5 + $0x3a4] ss:$16 sps:$4 sm:$0xff]  }
  0x7f   :  { %1088 = vmatprep.subr.bf16.mxu0 %v1827_v3  ;;  %v1883_v3 = vld [vmem:[#allocation5 + $0x4a8] ss:$16 sps:$4 sm:$0xff]  }
  0x82   :  { %1089 = vmatpush1.bf16.msra.mxu0 %v1825_v4  ;;  %v281_v4 = vrot.slane %v2109_v24, %v280_v63  ;;  %v1903_v24 = vld [vmem:[#allocation5 + $0x444] ss:$16 sps:$4 sm:$0xff]  }
  0x83   :  { %1090 = vmatprep.subr.bf16.mxu0 %v1832_v5  ;;  %v1880_v5 = vld [vmem:[#allocation5 + $0x3a0] ss:$16 sps:$4 sm:$0xff]  }
  0x86   :  { %1091 = vmatpush1.bf16.msra.mxu0 %v1830_v6  ;;  %v1884_v6 = vld [vmem:[#allocation5 + $0x3a8] ss:$16 sps:$4 sm:$0xff]  }
  0x87   :  { %1092 = vmatprep.subr.bf16.mxu0 %v1837_v7  ;;  %v1887_v7 = vld [vmem:[#allocation5 + $0x3c4] ss:$16 sps:$4 sm:$0xff]  }
  0x8a   :  { %1093 = vmatpush1.bf16.msra.mxu0 %v1835_v8  ;;  %v1888_v8 = vld [vmem:[#allocation5 + $0x4c8] ss:$16 sps:$4 sm:$0xff]  }
  0x8b   :  { %1094 = vmatprep.subr.bf16.mxu0 %v1842_v9 }
  0x8e   :  { %1095 = vmatpush1.bf16.msra.mxu0 %v1840_v10  ;;  %v1885_v10 = vld [vmem:[#allocation5 + $0x3c0] ss:$16 sps:$4 sm:$0xff]  }
  0x8f   :  { %1096 = vmatprep.subr.bf16.mxu0 %v1847_v11  ;;  %v1889_v11 = vld [vmem:[#allocation5 + $0x3c8] ss:$16 sps:$4 sm:$0xff]  }
  0x92   :  { %1097 = vmatpush1.bf16.msra.mxu0 %v1845_v13  ;;  %v1893_v13 = vld [vmem:[#allocation5 + $0x4e8] ss:$16 sps:$4 sm:$0xff]  }
  0x93   :  { %1098 = vmatprep.subr.bf16.mxu0 %v1852_v15  ;;  %v1890_v15 = vld [vmem:[#allocation5 + $0x3e0] ss:$16 sps:$4 sm:$0xff]  }
  0x96   :  { %1099 = vmatpush1.bf16.msra.mxu0 %v1850_v17  ;;  %v1897_v17 = vld [vmem:[#allocation5 + $0x404] ss:$16 sps:$4 sm:$0xff]  }
  0x97   :  { %1109 = vmatprep.subr.bf16.mxu0 %v1857_v19  ;;  %v1895_v19 = vld [vmem:[#allocation5 + $0x400] ss:$16 sps:$4 sm:$0xff]  }
 0x12c   :  { %v484_v28 = vpop.f32.mrb[0].mxu0  ;;  %v525_v48 = vpop.f32.mrb[0].mxu1 }
 0x12d   :  { %v485_v29 = vadd.f32 %v484_v28, %v273_v26  ;;  %v486_v30 = vpop.f32.mrb[1].mxu0  ;;  %v527_v49 = vpop.f32.mrb[1].mxu1  ;;  %v526_v9 = vadd.f32 %v525_v48, %v281_v4  ;;  %v1901_v26 = vld [vmem:[#allocation5 + $0x440] ss:$16 sps:$4 sm:$0xff]  }
 0x12e   :  { %v487_v31 = vadd.f32 %v486_v30, %v277_v27  ;;  %v488_v32 = vpop.f32.mrb[2].mxu0  ;;  %v528_v50 = vadd.f32 %v527_v49, %v285_v43  ;;  %v529_v51 = vpop.f32.mrb[2].mxu1  ;;  %v1906_v27 = vld [vmem:[#allocation5 + $0x464] ss:$16 sps:$4 sm:$0xff]   ;;  %v1904_v28 = vld [vmem:[#allocation5 + $0x460] ss:$16 sps:$4 sm:$0xff]  }
 0x12f   :  { %v532_v33 = vmax.f32 %v485_v29, 0.0  ;;  %v489_v34 = vpop.f32.mrb[3].mxu0  ;;  %v530_v54 = vpop.f32.mrb[3].mxu1  ;;  %v534_v14 = vmax.f32 %v526_v9, 0.0  ;;  %v1909_v29 = vld [vmem:[#allocation5 + $0x484] ss:$16 sps:$4 sm:$0xff]  }
 0x130   :  { %v533_v35 = vmax.f32 %v487_v31, 0.0  ;;  %v535_v57 = vmax.f32 %v528_v50, 0.0  ;;  %v1907_v30 = vld [vmem:[#allocation5 + $0x480] ss:$16 sps:$4 sm:$0xff]   ;;  %v1912_v31 = vld [vmem:[#allocation5 + $0x4a4] ss:$16 sps:$4 sm:$0xff]  }
 0x131   :  { %v536_v40 = vpack.c.bf16 %v532_v33, %v532_v33  ;;  %v538_v18 = vpack.c.bf16 %v534_v14, %v534_v14  ;;  %v1910_v32 = vld [vmem:[#allocation5 + $0x4a0] ss:$16 sps:$4 sm:$0xff]   ;;  %v1915_v33 = vld [vmem:[#allocation5 + $0x4c4] ss:$16 sps:$4 sm:$0xff]  }
 0x132   :  { %v537_v37 = vpack.c.bf16 %v533_v35, %v533_v35  ;;  %v539_v58 = vpack.c.bf16 %v535_v57, %v535_v57  ;;  %v1913_v34 = vld [vmem:[#allocation5 + $0x4c0] ss:$16 sps:$4 sm:$0xff]   ;;  %v1918_v35 = vld [vmem:[#allocation5 + $0x4e4] ss:$16 sps:$4 sm:$0xff]  }
 0x133   :  { %v1925_v43 = vld [vmem:[#allocation5 + $0x660] ss:$16 sps:$4 sm:$0xff]  }
 0x134   :  { %1100 = vmatprep.mubr.bf16.mxu0 %v537_v37  ;;  %1182 = vmatprep.mubr.bf16.mxu1 %v537_v37  ;;  %v1919_v37 = vld [vmem:[#allocation5 + $0x600] ss:$16 sps:$4 sm:$0xff]  }
 0x135   :  { %1101 = vmatmul.mubr.bf16.vlgmr.msra.gmra.mrb[4].mxu0 %v536_v40  ;;  %1183 = vmatmul.mubr.bf16.vlgmr.msra.gmra.mrb[4].mxu1 %v536_v40  ;;  %v1922_v40 = vld [vmem:[#allocation5 + $0x520] ss:$16 sps:$4 sm:$0xff]  }
 0x136   :  { %1110 = vmatpush1.bf16.msra.mxu0 %v1855_v38  ;;  %1654 = vmatpush3.bf16.msra.mxu1 %v1859_v39  ;;  %v1920_v38 = vld [vmem:[#allocation5 + $0x500] ss:$16 sps:$4 sm:$0xff]  }
 0x137   :  { %1111 = vmatprep.subr.bf16.mxu0 %v1862_v41  ;;  %1655 = vmatprep.subr.bf16.mxu1 %v1863_v42  ;;  %v1921_v39 = vld [vmem:[#allocation5 + $0x620] ss:$16 sps:$4 sm:$0xff]  }
 0x138   :  { %1222 = vmatprep.mubr.bf16.mxu1 %v539_v58  ;;  %1141 = vmatprep.mubr.bf16.mxu0 %v539_v58  ;;  %v1923_v41 = vld [vmem:[#allocation5 + $0x640] ss:$16 sps:$4 sm:$0xff]  }
 0x139   :  { %v1924_v42 = vld [vmem:[#allocation5 + $0x540] ss:$16 sps:$4 sm:$0xff]  }
 0x13a   :  { %1112 = vmatpush1.bf16.msra.mxu0 %v1860_v44  ;;  %1656 = vmatpush3.bf16.msra.mxu1 %v1864_v45  ;;  %v1926_v44 = vld [vmem:[#allocation5 + $0x560] ss:$16 sps:$4 sm:$0xff]  }
 0x13b   :  { %1113 = vmatprep.subr.bf16.mxu0 %v1867_v46  ;;  %1657 = vmatprep.subr.bf16.mxu1 %v1868_v47  ;;  %v1927_v45 = vld [vmem:[#allocation5 + $0x680] ss:$16 sps:$4 sm:$0xff]  }
 0x13c   :  { %v1928_v46 = vld [vmem:[#allocation5 + $0x580] ss:$16 sps:$4 sm:$0xff]  }
 0x13d   :  { %v1929_v47 = vld [vmem:[#allocation5 + $0x6a0] ss:$16 sps:$4 sm:$0xff]  }
 0x13e   :  { %1114 = vmatpush1.bf16.msra.mxu0 %v1865_v52  ;;  %1658 = vmatpush3.bf16.msra.mxu1 %v1869_v53  ;;  %v1930_v48 = vld [vmem:[#allocation5 + $0x5a0] ss:$16 sps:$4 sm:$0xff]   ;;  %v2047_v53 = vmov 0.0  }
 0x13f   :  { %1115 = vmatprep.subr.bf16.mxu0 %v1872_v55  ;;  %1659 = vmatprep.subr.bf16.mxu1 %v1873_v56  ;;  %v1931_v49 = vld [vmem:[#allocation5 + $0x6c0] ss:$16 sps:$4 sm:$0xff]  }
 0x140   :  { %v1932_v50 = vld [vmem:[#allocation5 + $0x5c0] ss:$16 sps:$4 sm:$0xff]  }
 0x141   :  { %v1933_v51 = vld [vmem:[#allocation5 + $0x6e0] ss:$16 sps:$4 sm:$0xff]  }
 0x142   :  { %1116 = vmatpush1.bf16.msra.mxu0 %v1870_v59  ;;  %1660 = vmatpush3.bf16.msra.mxu1 %v1874_v60  ;;  %v1934_v52 = vld [vmem:[#allocation5 + $0x5e0] ss:$16 sps:$4 sm:$0xff]  }
 0x143   :  { %1117 = vmatprep.subr.bf16.mxu0 %v1877_v61  ;;  %1661 = vmatprep.subr.bf16.mxu1 %v1878_v62  ;;  %v267_v59 = vld [vmem:[#allocation7 + $0x20] ss:$8 sm:$0x7] }
 0x144   :  { %v552_v60 = vrot.slane %v267_v59, %v280_v63 }
 0x146   :  { %1118 = vmatpush1.bf16.msra.mxu0 %v1875_v0  ;;  %1662 = vmatpush3.bf16.msra.mxu1 %v1879_v1 }
 0x147   :  { %1119 = vmatprep.subr.bf16.mxu0 %v1882_v2  ;;  %1663 = vmatprep.subr.bf16.mxu1 %v1883_v3 }
 0x14a   :  { %1120 = vmatpush1.bf16.msra.mxu0 %v1880_v5  ;;  %1664 = vmatpush3.bf16.msra.mxu1 %v1884_v6  ;;  %v544_v5 = vrot.slane %v267_v59, %v272_v23  ;;  %v548_v6 = vrot.slane %v267_v59, %v276_v25  ;;  %v1938_v23 = vld [vmem:[#allocation5 + $0x760] ss:$16 sps:$4 sm:$0xff]  }
 0x14b   :  { %1121 = vmatprep.subr.bf16.mxu0 %v1887_v7  ;;  %1665 = vmatprep.subr.bf16.mxu1 %v1888_v8  ;;  %v1939_v25 = vld [vmem:[#allocation5 + $0x780] ss:$16 sps:$4 sm:$0xff]  }
 0x14e   :  { %1122 = vmatpush1.bf16.msra.mxu0 %v1885_v10  ;;  %1666 = vmatpush3.bf16.msra.mxu1 %v1889_v11 }
 0x14f   :  { %1123 = vmatprep.subr.bf16.mxu0 %v1892_v12  ;;  %1667 = vmatprep.subr.bf16.mxu1 %v1893_v13 }
 0x152   :  { %1124 = vmatpush1.bf16.msra.mxu0 %v1890_v15  ;;  %1668 = vmatpush3.bf16.msra.mxu1 %v1894_v16  ;;  %v1935_v15 = vld [vmem:[#allocation5 + $0x700] ss:$16 sps:$4 sm:$0xff]  }
 0x153   :  { %1125 = vmatprep.subr.bf16.mxu0 %v1897_v17  ;;  %1675 = vmatprep.subr.bf16.mxu1 %v1919_v37  ;;  %v1936_v17 = vld [vmem:[#allocation5 + $0x720] ss:$16 sps:$4 sm:$0xff]  }
 0x155   :  { %1223 = vmatmul.mubr.bf16.vlgmr.msra.gmra.mrb[8].mxu1 %v538_v18 }
 0x156   :  { %1126 = vmatpush1.bf16.msra.mxu0 %v1895_v19  ;;  %1676 = vmatpush3.bf16.msra.mxu1 %v1920_v38  ;;  %v1941_v19 = vld [vmem:[#allocation5 + $0x7c0] ss:$16 sps:$4 sm:$0xff]  }
 0x157   :  { %1127 = vmatprep.subr.bf16.mxu0 %v1900_v20  ;;  %1677 = vmatprep.subr.bf16.mxu1 %v1921_v39  ;;  %v1942_v20 = vld [vmem:[#allocation5 + $0x7e0] ss:$16 sps:$4 sm:$0xff]  }
 0x15a   :  { %1128 = vmatpush1.bf16.msra.mxu0 %v1898_v21  ;;  %1678 = vmatpush3.bf16.msra.mxu1 %v1922_v40 }
 0x15b   :  { %1129 = vmatprep.subr.bf16.mxu0 %v1903_v24  ;;  %1679 = vmatprep.subr.bf16.mxu1 %v1923_v41 }
 0x15e   :  { %1130 = vmatpush1.bf16.msra.mxu0 %v1901_v26  ;;  %1680 = vmatpush3.bf16.msra.mxu1 %v1924_v42 }
 0x15f   :  { %1131 = vmatprep.subr.bf16.mxu0 %v1906_v27  ;;  %1681 = vmatprep.subr.bf16.mxu1 %v1925_v43 }
 0x162   :  { %1132 = vmatpush1.bf16.msra.mxu0 %v1904_v28  ;;  %1682 = vmatpush3.bf16.msra.mxu1 %v1926_v44 }
 0x163   :  { %1133 = vmatprep.subr.bf16.mxu0 %v1909_v29  ;;  %1683 = vmatprep.subr.bf16.mxu1 %v1927_v45 }
 0x166   :  { %1134 = vmatpush1.bf16.msra.mxu0 %v1907_v30  ;;  %1684 = vmatpush3.bf16.msra.mxu1 %v1928_v46 }
 0x167   :  { %1135 = vmatprep.subr.bf16.mxu0 %v1912_v31  ;;  %1685 = vmatprep.subr.bf16.mxu1 %v1929_v47  ;;  %v268_v31 = vld [vmem:[#allocation7 + $0x40] ss:$0 sm:$0xff] }
 0x16a   :  { %1136 = vmatpush1.bf16.msra.mxu0 %v1910_v32  ;;  %1686 = vmatpush3.bf16.msra.mxu1 %v1930_v48 }
 0x16b   :  { %1137 = vmatprep.subr.bf16.mxu0 %v1915_v33  ;;  %1687 = vmatprep.subr.bf16.mxu1 %v1931_v49 }
 0x16e   :  { %1138 = vmatpush1.bf16.msra.mxu0 %v1913_v34  ;;  %1688 = vmatpush3.bf16.msra.mxu1 %v1932_v50 }
 0x16f   :  { %1139 = vmatprep.subr.bf16.mxu0 %v1918_v35  ;;  %1689 = vmatprep.subr.bf16.mxu1 %v1933_v51 }
 0x172   :  { %1140 = vmatpush1.bf16.msra.mxu0 %v1916_v36  ;;  %1690 = vmatpush3.bf16.msra.mxu1 %v1934_v52 }
 0x173   :  { %1706 = vmatprep.subr.bf16.mxu1 %v2047_v53 }
 0x175   :  { %1142 = vmatmul.mubr.bf16.vlgmr.msra.gmra.mrb[4].mxu0 %v538_v18  ;;  %v1940_v18 = vld [vmem:[#allocation5 + $0x7a0] ss:$16 sps:$4 sm:$0xff]  }
 0x208   :  { %v1647_v54 = vpop.f32.mrb[4].mxu1 }
 0x209   :  { %v1648_v55 = vpop.f32.mrb[5].mxu1 }
 0x20a   :  { %v1649_v56 = vadd.f32 %v1648_v55, %v1647_v54  ;;  %v1650_v57 = vpop.f32.mrb[6].mxu1 }
 0x20b   :  { %v1651_v58 = vpop.f32.mrb[7].mxu1 }
 0x20c   :  { %v1185_v0 = vadd.f32 %v1649_v56, %v552_v60 }
 0x228   :  { %v1669_v61 = vpop.f32.mrb[8].mxu1 }
 0x229   :  { %v1670_v62 = vpop.f32.mrb[9].mxu1 }
 0x22a   :  { %v1671_v1 = vadd.f32 %v1670_v62, %v1669_v61  ;;  %v1672_v2 = vpop.f32.mrb[10].mxu1 }
 0x22b   :  { %v1673_v3 = vpop.f32.mrb[11].mxu1 }
 0x22c   :  { %v1225_v4 = vadd.f32 %v1671_v1, %v1185_v0 }
 0x22e   :  { %v1232_v21 = vmax.f32 %v1225_v4, 0.0 }
 0x230   :  { %v1235_v24 = vpack.c.bf16 %v1232_v21, %v1232_v21 }
 0x248   :  { %v1143_v7 = vpop.f32.mrb[4].mxu0 }
 0x249   :  { %v1726_v8 = vadd.f32 %v1143_v7, %v544_v5  ;;  %v1145_v9 = vpop.f32.mrb[5].mxu0 }
 0x24a   :  { %v1727_v10 = vadd.f32 %v1145_v9, %v548_v6  ;;  %v1147_v11 = vpop.f32.mrb[6].mxu0 }
 0x24b   :  { %v1230_v12 = vmax.f32 %v1726_v8, 0.0  ;;  %v1148_v63 = vpop.f32.mrb[7].mxu0 }
 0x24c   :  { %v1231_v13 = vmax.f32 %v1727_v10, 0.0 }
 0x24d   :  { %v1233_v16 = vpack.c.bf16 %v1230_v12, %v1230_v12 }
 0x24e   :  { %v1234_v14 = vpack.c.bf16 %v1231_v13, %v1231_v13 }
 0x250   :  { %1412 = vmatprep.mubr.bf16.mxu1 %v1234_v14 }
 0x251   :  { %1413 = vmatmul.mubr.bf16.vlgmr.msra.gmra.mrb[12].mxu1 %v1233_v16 }
 0x252   :  { %1707 = vmatpush3.bf16.msra.mxu1 %v1935_v15  ;;  %1722 = vmatprep.mubr.msk.bf16.mxu1 %vm2048_vm0, %v2047_v53 }
 0x253   :  { %1708 = vmatprep.subr.bf16.mxu1 %v2047_v53 }
 0x256   :  { %1709 = vmatpush3.bf16.msra.mxu1 %v1936_v17 }
 0x257   :  { %1710 = vmatprep.subr.bf16.mxu1 %v2047_v53 }
 0x25a   :  { %1711 = vmatpush3.bf16.msra.mxu1 %v1937_v22 }
 0x25b   :  { %1712 = vmatprep.subr.bf16.mxu1 %v2047_v53 }
 0x25e   :  { %1713 = vmatpush3.bf16.msra.mxu1 %v1938_v23 }
 0x25f   :  { %1714 = vmatprep.subr.bf16.mxu1 %v2047_v53 }
 0x262   :  { %1715 = vmatpush3.bf16.msra.mxu1 %v1939_v25 }
 0x263   :  { %1716 = vmatprep.subr.bf16.mxu1 %v2047_v53 }
 0x266   :  { %1717 = vmatpush3.bf16.msra.mxu1 %v1940_v18 }
 0x267   :  { %1718 = vmatprep.subr.bf16.mxu1 %v2047_v53 }
 0x26a   :  { %1719 = vmatpush3.bf16.msra.mxu1 %v1941_v19 }
 0x26b   :  { %1720 = vmatprep.subr.bf16.mxu1 %v2047_v53 }
 0x26e   :  { %1721 = vmatpush3.bf16.msra.mxu1 %v1942_v20 }
 0x271   :  { %1723 = vmatmul.mubr.bf16.vlgmr.msra.gmra.mrb[16].mxu1 %v1235_v24 }
 0x324   :  { %v1691_v26 = vpop.f32.mrb[12].mxu1 }
 0x325   :  { %v1692_v27 = vpop.f32.mrb[13].mxu1 }
 0x326   :  { %v1693_v28 = vadd.f32 %v1692_v27, %v1691_v26  ;;  %v1694_v29 = vpop.f32.mrb[14].mxu1 }
 0x327   :  { %v1695_v30 = vpop.f32.mrb[15].mxu1 }
 0x328   :  { %v1415_v32 = vadd.f32 %v1693_v28, %v268_v31 }
 0x344   :  { %v1454_v33 = vpop.f32.mrb[16].mxu1 }
 0x345   :  { %v1455_v34 = vadd.f32 %v1454_v33, %v1415_v32  ;;  %v1724_v35 = vpop.f32.mrb[17].mxu1 }
 0x346   :  { %v1457_v36 = vpop.f32.mrb[18].mxu1 }
 0x347   :  { %1943 = vtanh.f32 %v1455_v34  ;;  %v1725_v37 = vpop.f32.mrb[19].mxu1 }
 0x351   :  { %v1944_v38 = vpop.eup %1943 }
 0x352   :  { %v1461_v39 = vmul.f32 2.0, %v1944_v38 }
 0x354   :  { %1462 = vst [vmem:[#allocation8] sm:$0xff] %v1461_v39 }
 0x355   :  { %2022 = shalt.err (!%p2019_p0)
}
 0x356   :  { %s2023_s27 = scalar_lea.hbm %s2145_s3, 128 }
 0x357   :  { %p2024_p1 = scmp.ne.s32.totalorder %s2145_s3, %s2023_s27  ;;  %p2027_p2 = scmp.lt.u32.totalorder %s2023_s27, %s2145_s3 }
 0x359   :  { %p2029_p3 = pnand %p2027_p2, %p2024_p1 }
 0x35b   :  { %2032 = shalt.err (!%p2029_p3)
}
 0x35c   :  { %1472 = dma.vmem_to_hbm [thread:$0]  %s1470_s23, 128, %s2145_s3, [#allocation4]  }
 0x35d   :  { %2037 = dma.done.wait [#allocation4], 128  }
 0x35e   :  { %2038 = vsyncadd [#allocation4], 4294967168 }
 0x35f   :  { %1476 = vsyncpa [#allocation3], 1 }
 0x360   :  { %1477 = vsyncpa [#allocation6], 1 }
 0x361   :  { %1478 = vsyncpa [#allocation4], 1 }

</bundles_post_ra>
